<compile_context>
chip_gen: v5e
topology: v5e:2x2
jax: 0.10.0
libtpu: 0.0.40
codegen_flags: <defaults>
</compile_context>

<pallas_src>
import functools
from typing import NamedTuple

import jax
import jax.numpy as jnp
from jax.experimental import pallas as pl
from jax.experimental.pallas import tpu as pltpu

_SUBLANE = 8  # f32 sublane tiling unit


# --------------------------------------------------------------------------- #
# Small host-side helpers (hardware-aware planning)
# --------------------------------------------------------------------------- #
def _round_up(n, m):
    return ((n + m - 1) // m) * m


def _device_kind():
    try:
        return jax.devices()[0].device_kind.lower()
    except Exception:
        return ""


def _vmem_limits():
    """(vmem_limit_bytes, planning_budget) sized to the chip generation."""
    try:
        cap = pltpu.get_tpu_info().vmem_capacity_bytes
    except Exception:
        cap = 64 * 1024 * 1024            # conservative (v7x-sized) default
    limit = (cap * 3) // 4                # ~96 MiB on 128 MiB chips, 48 MiB on v7x
    budget = limit - 8 * 1024 * 1024      # headroom for compiler scratch/bookkeeping
    return int(limit), int(budget)


def _mxu_lane():
    """MXU column width: 256 on v6e/v7x (256x256 MXU), 128 otherwise."""
    kind = _device_kind()
    if "v6" in kind or "v7" in kind or "trillium" in kind:
        return 256
    return 128


def _num_tensorcores():
    # v7x has 2 TensorCores per chip; v5e/v6e have 1.
    return 2 if "v7" in _device_kind() else 1


def _pad2(a, rows, cols, dtype):
    a = a.astype(dtype)
    return jnp.pad(a, ((0, rows - a.shape[0]), (0, cols - a.shape[1])))


def _block_b_cap(x_in_p, hid_p, hid2_p, vmem_budget):
    """Largest batch tile (multiple of 8) that keeps everything inside VMEM.

    Returns 0 when the resident-weights plan itself doesn't fit.
    """
    bf16, f32 = 2, 4
    # Weights/biases are single-buffered (pl.Buffered(1), constant index_map).
    w_bytes = (bf16 * (x_in_p * hid_p + hid_p * hid2_p + hid2_p * hid_p)
               + f32 * (2 * hid_p + hid2_p))
    # Per batch row: f32 x tile (2 buffers), f32 out tile (2 buffers),
    # bf16 in-kernel recast of x, f32 h1/h2 intermediates plus bf16 recasts.
    row_bytes = (2 * f32 * x_in_p + 2 * f32 * hid_p
                 + bf16 * x_in_p + (f32 + bf16) * (hid_p + hid2_p))
    avail = vmem_budget - w_bytes
    if avail < row_bytes * _SUBLANE:
        return 0
    cap = min(avail // row_bytes, 1024)         # 512-1024 rows ~ HBM roofline
    return max(_SUBLANE, (cap // _SUBLANE) * _SUBLANE)


# --------------------------------------------------------------------------- #
# Kernel
# --------------------------------------------------------------------------- #
def _sigmoid_f32(z):
    # 0.5*(tanh(z/2)+1) == logistic(z): one EUP push instead of exp + reciprocal.
    return 0.5 * (jnp.tanh(0.5 * z) + 1.0)


def ae_encoder_kernel(x_ref, w1_ref, b1_ref, w2_ref, b2_ref, w3_ref, b3_ref,
                      o_ref):
    """Fused 3-layer MLP on one batch tile: sigmoid(fc1) -> sigmoid(fc2) -> fc3."""
    # Cast x to the compute dtype inside the kernel (no wrapper HBM round trip).
    x = x_ref[...].astype(w1_ref.dtype)                       # (block_b, x_in_p) bf16
    # fc1: bf16 MXU matmul, f32 accumulate; bias add + sigmoid in f32.
    h1 = jnp.dot(x, w1_ref[...], preferred_element_type=jnp.float32)
    h1 = _sigmoid_f32(h1 + b1_ref[...])
    # fc2
    h2 = jnp.dot(h1.astype(w2_ref.dtype), w2_ref[...],
                 preferred_element_type=jnp.float32)
    h2 = _sigmoid_f32(h2 + b2_ref[...])
    # fc3 (no activation)
    out = jnp.dot(h2.astype(w3_ref.dtype), w3_ref[...],
                  preferred_element_type=jnp.float32)
    # NOTE: f32 output doubles out-tile VMEM + writeback HBM vs bf16; keep the
    # module's f32 semantics here.
    o_ref[...] = (out + b3_ref[...]).astype(o_ref.dtype)


# --------------------------------------------------------------------------- #
# Parameter preparation (pad + cast ONCE, outside the per-call jit path)
# --------------------------------------------------------------------------- #
class AEDims(NamedTuple):
    x_in: int
    x_in_p: int
    hid: int
    hid_p: int
    hid2: int
    hid2_p: int
    lane: int


def prepare_params(w1, b1, w2, b2, w3, b3, *, lane=None,
                   compute_dtype=jnp.bfloat16):
    """Pad weights to lane-dense multiples and cast to bf16 once.

    Padding MUST be zeros (done here): the zero-padded rows of w2/w3 are what
    cancel sigmoid(0)=0.5 coming from padded hidden units, keeping the result
    exact.  Do not pre-pad externally with non-zero values.
    """
    x_in, hid = w1.shape
    hid2 = w2.shape[1]
    assert w2.shape[0] == hid and w3.shape == (hid2, hid)

    x_in_p = _round_up(x_in, 16)            # bf16 sublane packing for w1 rows / fc1 K
    if lane is None:
        lane = _mxu_lane()
        if lane == 256:
            # On small-VMEM chips (v7x 64 MiB) only take the 256-lane padding
            # if the padded resident weights still fit; else keep 128.
            _, budget = _vmem_limits()
            if _block_b_cap(x_in_p, _round_up(hid, 256), _round_up(hid2, 256),
                            budget) == 0:
                lane = 128
    hid_p = _round_up(hid, lane)
    hid2_p = _round_up(hid2, lane)

    params = (_pad2(w1, x_in_p, hid_p, compute_dtype),
              _pad2(b1, 1, hid_p, jnp.float32),
              _pad2(w2, hid_p, hid2_p, compute_dtype),
              _pad2(b2, 1, hid2_p, jnp.float32),
              _pad2(w3, hid2_p, hid_p, compute_dtype),
              _pad2(b3, 1, hid_p, jnp.float32))
    return params, AEDims(x_in, x_in_p, hid, hid_p, hid2, hid2_p, lane)


# --------------------------------------------------------------------------- #
# pallas_call wrapper
# --------------------------------------------------------------------------- #
@functools.partial(jax.jit, static_argnames=("dims", "block_b", "vmem_limit"))
def _ae_encoder_pallas(x, w1p, b1p, w2p, b2p, w3p, b3p, *, dims, block_b,
                       vmem_limit):
    B = x.shape[0]
    B_p = _round_up(B, block_b)
    x_p = x
    if B_p != B or dims.x_in_p != dims.x_in:
        # Only the activation tensor is (possibly) padded per call; no dtype cast.
        x_p = jnp.pad(x, ((0, B_p - B), (0, dims.x_in_p - dims.x_in)))

    # Resident weights/biases: constant index_map + single buffer (no 2x VMEM tax).
    def resident(shape):
        return pl.BlockSpec(shape, lambda i: (0, 0),
                            pipeline_mode=pl.Buffered(1))

    out_p = pl.pallas_call(
        ae_encoder_kernel,
        out_shape=jax.ShapeDtypeStruct((B_p, dims.hid_p), x.dtype),
        grid_spec=pltpu.PrefetchScalarGridSpec(
            num_scalar_prefetch=0,
            grid=(B_p // block_b,),
            in_specs=[
                pl.BlockSpec((block_b, dims.x_in_p), lambda i: (i, 0)),  # x tile
                resident((dims.x_in_p, dims.hid_p)),                     # w1
                resident((1, dims.hid_p)),                               # b1
                resident((dims.hid_p, dims.hid2_p)),                     # w2
                resident((1, dims.hid2_p)),                              # b2
                resident((dims.hid2_p, dims.hid_p)),                     # w3
                resident((1, dims.hid_p)),                               # b3
            ],
            out_specs=pl.BlockSpec((block_b, dims.hid_p), lambda i: (i, 0)),
        ),
        compiler_params=pltpu.CompilerParams(
            dimension_semantics=("parallel",),
            vmem_limit_bytes=vmem_limit),
    )(x_p, w1p, b1p, w2p, b2p, w3p, b3p)
    return out_p[:B, :dims.hid]


@functools.partial(jax.jit, static_argnames=("dims",))
def _ae_encoder_xla_padded(x, w1p, b1p, w2p, b2p, w3p, b3p, *, dims):
    """Graceful XLA fallback when the resident-weights plan exceeds VMEM."""
    w1 = w1p[:dims.x_in].astype(jnp.float32)
    h1 = jax.nn.sigmoid(x @ w1 + b1p)
    h2 = jax.nn.sigmoid(h1 @ w2p.astype(jnp.float32) + b2p)
    out = h2 @ w3p.astype(jnp.float32) + b3p
    return out[:, :dims.hid]


def ae_encoder(x, prepared_params, dims, *, block_b=None):
    """x: (B, x_in) f32.  prepared_params/dims come from prepare_params()."""
    B = x.shape[0]
    vmem_limit, vmem_budget = _vmem_limits()

    if block_b is None:
        cap = _block_b_cap(dims.x_in_p, dims.hid_p, dims.hid2_p, vmem_budget)
        if cap == 0:
            # TODO(synk): K/N-tile fc2/fc3 over an 'arbitrary' grid axis with an
            # f32 VMEM accumulator (pl.when init/finalize) instead of falling
            # back to XLA when resident weights exceed the VMEM budget.
            return _ae_encoder_xla_padded(x, *prepared_params, dims=dims)
        B8 = _round_up(B, _SUBLANE)
        if B8 <= cap:
            # Whole batch fits: still split into >=2 grid steps (>=4 on 2-TC
            # chips) so DMAs overlap compute and megacore shards the axis.
            target_steps = 2 * _num_tensorcores()
            per = ((B8 // target_steps) // _SUBLANE) * _SUBLANE
            block_b = per if per >= _SUBLANE else B8
        else:
            block_b = cap
    assert block_b % _SUBLANE == 0, "block_b must be a multiple of 8"

    return _ae_encoder_pallas(x, *prepared_params, dims=dims, block_b=block_b,
                              vmem_limit=vmem_limit)


# --------------------------------------------------------------------------- #
# Reference + init (matches torch.nn.Linear defaults, weights stored (in, out))
# --------------------------------------------------------------------------- #
def ae_encoder_ref(x, w1, b1, w2, b2, w3, b3):
    """Pure-f32 reference matching the PyTorch module."""
    h1 = jax.nn.sigmoid(x @ w1 + b1)
    h2 = jax.nn.sigmoid(h1 @ w2 + b2)
    return h2 @ w3 + b3


def init_params(key, x_in_dim, x_hidden_dim, dtype=jnp.float32):
    """torch.nn.Linear default init (uniform +-1/sqrt(fan_in)); stored (in, out)."""
    def linear(k, fan_in, fan_out):
        kw, kb = jax.random.split(k)
        bound = 1.0 / jnp.sqrt(fan_in)
        w = jax.random.uniform(kw, (fan_in, fan_out), dtype, -bound, bound)
        b = jax.random.uniform(kb, (1, fan_out), dtype, -bound, bound)
        return w, b

    k1, k2, k3 = jax.random.split(key, 3)
    w1, b1 = linear(k1, x_in_dim, x_hidden_dim)
    w2, b2 = linear(k2, x_hidden_dim, 2 * x_hidden_dim)
    w3, b3 = linear(k3, 2 * x_hidden_dim, x_hidden_dim)
    return w1, b1, w2, b2, w3, b3


if __name__ == "__main__":
    key = jax.random.PRNGKey(0)
    k_x, k_p = jax.random.split(key)

    B, x_in_dim, x_hidden_dim = 8, 16, 32
    x = jax.random.normal(k_x, (B, x_in_dim), dtype=jnp.float32)
    raw_params = init_params(k_p, x_in_dim, x_hidden_dim)

    # Pad + cast weights ONCE, outside the per-call path.
    prepared, dims = prepare_params(*raw_params)

    out = ae_encoder(x, prepared, dims)
    out = jax.block_until_ready(out)

    ref = ae_encoder_ref(x, *raw_params)
    assert out.shape == (B, x_hidden_dim)
    # Kernel feeds the MXU bf16 (f32 accumulation): bf16-level tolerance.
    assert jnp.allclose(out, ref, atol=5e-2, rtol=5e-2), float(
        jnp.max(jnp.abs(out - ref)))

    print("KERNEL_OK")
</pallas_src>

<mosaic_0001>
module attributes {stable_mosaic.version = 11 : i64} {
  func.func @ae_encoder_kernel(%arg0: i32, %arg1: memref<8x16xf32, #tpu.memory_space<vmem>>, %arg2: memref<16x128xbf16, #tpu.memory_space<vmem>>, %arg3: memref<1x128xf32, #tpu.memory_space<vmem>>, %arg4: memref<128x128xbf16, #tpu.memory_space<vmem>>, %arg5: memref<1x128xf32, #tpu.memory_space<vmem>>, %arg6: memref<128x128xbf16, #tpu.memory_space<vmem>>, %arg7: memref<1x128xf32, #tpu.memory_space<vmem>>, %arg8: memref<8x128xf32, #tpu.memory_space<vmem>>) attributes {dimension_semantics = [#tpu.dimension_semantics<parallel>], iteration_bounds = array<i64: 1>, scalar_prefetch = 0 : i64, scratch_operands = 0 : i64, tpu.core_type = #tpu.core_type<tc>, window_params = [{transform_indices = @transform_0, window_bounds = array<i64: 8, 16>}, {pipeline_mode = #tpu.pipeline_mode<synchronous>, transform_indices = @transform_1, window_bounds = array<i64: 16, 128>}, {pipeline_mode = #tpu.pipeline_mode<synchronous>, transform_indices = @transform_2, window_bounds = array<i64: 1, 128>}, {pipeline_mode = #tpu.pipeline_mode<synchronous>, transform_indices = @transform_3, window_bounds = array<i64: 128, 128>}, {pipeline_mode = #tpu.pipeline_mode<synchronous>, transform_indices = @transform_4, window_bounds = array<i64: 1, 128>}, {pipeline_mode = #tpu.pipeline_mode<synchronous>, transform_indices = @transform_5, window_bounds = array<i64: 128, 128>}, {pipeline_mode = #tpu.pipeline_mode<synchronous>, transform_indices = @transform_6, window_bounds = array<i64: 1, 128>}, {transform_indices = @transform_7, window_bounds = array<i64: 8, 128>}]} {
    %c0 = arith.constant 0 : index
    %c0_0 = arith.constant 0 : index
    %0 = vector.load %arg1[%c0, %c0_0] : memref<8x16xf32, #tpu.memory_space<vmem>>, vector<8x16xf32>
    %1 = arith.truncf %0 : vector<8x16xf32> to vector<8x16xbf16>
    %c0_1 = arith.constant 0 : index
    %c0_2 = arith.constant 0 : index
    %2 = vector.load %arg2[%c0_1, %c0_2] : memref<16x128xbf16, #tpu.memory_space<vmem>>, vector<16x128xbf16>
    %cst = arith.constant dense<0.000000e+00> : vector<8x128xf32>
    %3 = tpu.matmul %1, %2, %cst {dimension_numbers = #tpu.dot_dimension_numbers<[1], [0], [0], [1], [0, 0, 1, 1], [], []>} : vector<8x16xbf16>, vector<16x128xbf16>, vector<8x128xf32> -> vector<8x128xf32>
    %c0_3 = arith.constant 0 : index
    %c0_4 = arith.constant 0 : index
    %4 = vector.load %arg3[%c0_3, %c0_4] : memref<1x128xf32, #tpu.memory_space<vmem>>, vector<1x128xf32>
    %5 = vector.broadcast %4 : vector<1x128xf32> to vector<8x128xf32>
    %6 = arith.addf %3, %5 : vector<8x128xf32>
    %cst_5 = arith.constant 5.000000e-01 : f32
    %7 = vector.broadcast %cst_5 : f32 to vector<8x128xf32>
    %8 = arith.mulf %7, %6 : vector<8x128xf32>
    %9 = math.tanh %8 : vector<8x128xf32>
    %cst_6 = arith.constant 1.000000e+00 : f32
    %10 = vector.broadcast %cst_6 : f32 to vector<8x128xf32>
    %11 = arith.addf %9, %10 : vector<8x128xf32>
    %cst_7 = arith.constant 5.000000e-01 : f32
    %12 = vector.broadcast %cst_7 : f32 to vector<8x128xf32>
    %13 = arith.mulf %12, %11 : vector<8x128xf32>
    %14 = arith.truncf %13 : vector<8x128xf32> to vector<8x128xbf16>
    %c0_8 = arith.constant 0 : index
    %c0_9 = arith.constant 0 : index
    %15 = vector.load %arg4[%c0_8, %c0_9] : memref<128x128xbf16, #tpu.memory_space<vmem>>, vector<128x128xbf16>
    %cst_10 = arith.constant dense<0.000000e+00> : vector<8x128xf32>
    %16 = tpu.matmul %14, %15, %cst_10 {dimension_numbers = #tpu.dot_dimension_numbers<[1], [0], [0], [1], [0, 0, 1, 1], [], []>} : vector<8x128xbf16>, vector<128x128xbf16>, vector<8x128xf32> -> vector<8x128xf32>
    %c0_11 = arith.constant 0 : index
    %c0_12 = arith.constant 0 : index
    %17 = vector.load %arg5[%c0_11, %c0_12] : memref<1x128xf32, #tpu.memory_space<vmem>>, vector<1x128xf32>
    %18 = vector.broadcast %17 : vector<1x128xf32> to vector<8x128xf32>
    %19 = arith.addf %16, %18 : vector<8x128xf32>
    %cst_13 = arith.constant 5.000000e-01 : f32
    %20 = vector.broadcast %cst_13 : f32 to vector<8x128xf32>
    %21 = arith.mulf %20, %19 : vector<8x128xf32>
    %22 = math.tanh %21 : vector<8x128xf32>
    %cst_14 = arith.constant 1.000000e+00 : f32
    %23 = vector.broadcast %cst_14 : f32 to vector<8x128xf32>
    %24 = arith.addf %22, %23 : vector<8x128xf32>
    %cst_15 = arith.constant 5.000000e-01 : f32
    %25 = vector.broadcast %cst_15 : f32 to vector<8x128xf32>
    %26 = arith.mulf %25, %24 : vector<8x128xf32>
    %27 = arith.truncf %26 : vector<8x128xf32> to vector<8x128xbf16>
    %c0_16 = arith.constant 0 : index
    %c0_17 = arith.constant 0 : index
    %28 = vector.load %arg6[%c0_16, %c0_17] : memref<128x128xbf16, #tpu.memory_space<vmem>>, vector<128x128xbf16>
    %cst_18 = arith.constant dense<0.000000e+00> : vector<8x128xf32>
    %29 = tpu.matmul %27, %28, %cst_18 {dimension_numbers = #tpu.dot_dimension_numbers<[1], [0], [0], [1], [0, 0, 1, 1], [], []>} : vector<8x128xbf16>, vector<128x128xbf16>, vector<8x128xf32> -> vector<8x128xf32>
    %c0_19 = arith.constant 0 : index
    %c0_20 = arith.constant 0 : index
    %30 = vector.load %arg7[%c0_19, %c0_20] : memref<1x128xf32, #tpu.memory_space<vmem>>, vector<1x128xf32>
    %31 = vector.broadcast %30 : vector<1x128xf32> to vector<8x128xf32>
    %32 = arith.addf %29, %31 : vector<8x128xf32>
    %c0_21 = arith.constant 0 : index
    %c0_22 = arith.constant 0 : index
    %33 = vector.load %arg8[%c0_21, %c0_22] : memref<8x128xf32, #tpu.memory_space<vmem>>, vector<8x128xf32>
    tpu.vector_store %arg8[%c0_21, %c0_22], %32 {strides = array<i32>} : memref<8x128xf32, #tpu.memory_space<vmem>>, vector<8x128xf32>,
    return
  }
  func.func @transform_0(%arg0: i32) -> (i32, i32) {
    %c0_i32 = arith.constant 0 : i32
    %c0_i32_0 = arith.constant 0 : i32
    return %arg0, %c0_i32 : i32, i32
  }
  func.func @transform_1(%arg0: i32) -> (i32, i32) {
    %c0_i32 = arith.constant 0 : i32
    %c0_i32_0 = arith.constant 0 : i32
    %c0_i32_1 = arith.constant 0 : i32
    return %c0_i32, %c0_i32_0 : i32, i32
  }
  func.func @transform_2(%arg0: i32) -> (i32, i32) {
    %c0_i32 = arith.constant 0 : i32
    %c0_i32_0 = arith.constant 0 : i32
    %c0_i32_1 = arith.constant 0 : i32
    return %c0_i32, %c0_i32_0 : i32, i32
  }
  func.func @transform_3(%arg0: i32) -> (i32, i32) {
    %c0_i32 = arith.constant 0 : i32
    %c0_i32_0 = arith.constant 0 : i32
    %c0_i32_1 = arith.constant 0 : i32
    return %c0_i32, %c0_i32_0 : i32, i32
  }
  func.func @transform_4(%arg0: i32) -> (i32, i32) {
    %c0_i32 = arith.constant 0 : i32
    %c0_i32_0 = arith.constant 0 : i32
    %c0_i32_1 = arith.constant 0 : i32
    return %c0_i32, %c0_i32_0 : i32, i32
  }
  func.func @transform_5(%arg0: i32) -> (i32, i32) {
    %c0_i32 = arith.constant 0 : i32
    %c0_i32_0 = arith.constant 0 : i32
    %c0_i32_1 = arith.constant 0 : i32
    return %c0_i32, %c0_i32_0 : i32, i32
  }
  func.func @transform_6(%arg0: i32) -> (i32, i32) {
    %c0_i32 = arith.constant 0 : i32
    %c0_i32_0 = arith.constant 0 : i32
    %c0_i32_1 = arith.constant 0 : i32
    return %c0_i32, %c0_i32_0 : i32, i32
  }
  func.func @transform_7(%arg0: i32) -> (i32, i32) {
    %c0_i32 = arith.constant 0 : i32
    %c0_i32_0 = arith.constant 0 : i32
    return %arg0, %c0_i32 : i32, i32
  }
}

</mosaic_0001>

<bundles_post_ra>
// kernel: _ae_encoder_pallas.1
= control target key start
LH: loop header
LB: loop body
LE: loop exit
PB: predicated region body
PF: predicated region fallthrough
CT: control target
= control target key end

     0   :  { %12 = vsyncpa [#allocation3], 0  ;;  %s611_s0 = inlined_call_operand.hbm [shape: f32[8,16], index: 0, kind: input, shape index: {}]   ;;  %s612_s1 = inlined_call_operand.hbm [shape: bf16[16,128], index: 1, kind: input, shape index: {}]   ;;  %s613_s2 = inlined_call_operand.vmem [shape: f32[1,128], index: 2, kind: input, shape index: {}]   ;;  %s614_s3 = inlined_call_operand.hbm [shape: bf16[128,128], index: 3, kind: input, shape index: {}]   ;;  %s615_s4 = inlined_call_operand.vmem [shape: f32[1,128], index: 4, kind: input, shape index: {}]   ;;  %s616_s5 = inlined_call_operand.hbm [shape: bf16[128,128], index: 5, kind: input, shape index: {}]   ;;  %s617_s6 = inlined_call_operand.vmem [shape: f32[1,128], index: 6, kind: input, shape index: {}]   ;;  %s618_s7 = inlined_call_operand.hbm [shape: f32[8,128], index: 7, kind: output, shape index: {}]  }
   0x1   :  { %13 = vsyncpa [#allocation6], 0 }
   0x2   :  { %14 = vsyncpa [#allocation9], 0  ;;  %s31_s26 = sshll.u32 %s612_s1, 4  ;;  %s32_s26 = int_to_ptr.hbm [resolvable:$true] %s31_s26 }
   0x3   :  { %15 = vsyncpa [#allocation4], 0  ;;  %s540_s27 = smov [#allocation5]   ;;  %s21_s8 = sshll.u32 %s611_s0, 4  ;;  %s22_s8 = int_to_ptr.hbm [resolvable:$true] %s21_s8 }
   0x4   :  { %s33_s28 = sshll.u32 %s540_s27, 4  ;;  %s541_s9 = smov 64   ;;  %s34_s28 = int_to_ptr.vmem [resolvable:$true] %s33_s28 }
   0x5   :  { %s542_s10 = smov 4   ;;  %s543_s11 = smov [#allocation2]  }
   0x6   :  { %39 = dma.hbm_to_vmem [thread:$0]  %s32_s26, 128, %s34_s28, [#allocation6], %s541_s9, %s541_s9, %s542_s10  }
   0x7   :  { %s23_s12 = sshll.u32 %s543_s11, 4  ;;  %s46_s15 = sshll.u32 %s614_s3, 4  ;;  %s24_s12 = int_to_ptr.vmem [resolvable:$true] %s23_s12  ;;  %s47_s15 = int_to_ptr.hbm [resolvable:$true] %s46_s15 }
   0x8   :  { %26 = dma.hbm_to_vmem [thread:$0]  %s22_s8, 128, %s24_s12, [#allocation3]  }
   0x9   :  { %s61_s17 = sshll.u32 %s616_s5, 4  ;;  %s544_s18 = smov [#allocation7]   ;;  %s62_s17 = int_to_ptr.hbm [resolvable:$true] %s61_s17 }
   0xa   :  { %s48_s19 = sshll.u32 %s544_s18, 4  ;;  %s545_s0 = smov [#allocation8]   ;;  %s49_s19 = int_to_ptr.vmem [resolvable:$true] %s48_s19 }
   0xb   :  { %54 = dma.hbm_to_vmem [thread:$0]  %s47_s15, 1024, %s49_s19, [#allocation6], %s541_s9, %s541_s9, %s542_s10  }
   0xc   :  { %s63_s20 = sshll.u32 %s545_s0, 4  ;;  %s64_s20 = int_to_ptr.vmem [resolvable:$true] %s63_s20 }
   0xd   :  { %69 = dma.hbm_to_vmem [thread:$0]  %s62_s17, 1024, %s64_s20, [#allocation9], %s541_s9, %s541_s9, %s542_s10  }
   0xe   :  { %532 = dma.done.wait [#allocation3], 128  }
   0xf   :  { %533 = vsyncadd [#allocation3], 4294967168 }
  0x10   :  { %534 = dma.done.wait [#allocation6], 1152  }
  0x11   :  { %535 = vsyncadd [#allocation6], 4294966144 }
  0x12   :  { %536 = dma.done.wait [#allocation9], 1024  }
  0x13   :  { %537 = vsyncadd [#allocation9], 4294966272  ;;  %v381_v0 = vld [vmem:[#allocation5] sm:$0xff]  ;;  %v89_v1 = vld [vmem:[#allocation2] sm:$0xff]  ;;  %vm103_vm0 = vcmask 130048   ;;  %s546_s24 = smov [#allocation10]  }
  0x14   :  { %v389_v2 = vld [vmem:[#allocation7 + $0x38] sm:$0xff]  ;;  %v90_v3 = vpack.c.bf16 %v89_v1, %v89_v1  ;;  %114 = vmatpush.bf16.msra.mxu0 %v381_v0  ;;  %v388_v4 = vld [vmem:[#allocation7 + $0x30] sm:$0xff]  ;;  %v387_v5 = vld [vmem:[#allocation7 + $0x28] sm:$0xff]  ;;  %s298_s25 = sshll.u32 %s546_s24, 4  ;;  %s299_s25 = int_to_ptr.vmem [resolvable:$true] %s298_s25 }
  0x15   :  { %193 = vmatpush.bf16.msra.mxu1 %v389_v2  ;;  %v386_v6 = vld [vmem:[#allocation7 + $0x20] sm:$0xff]  ;;  %v385_v7 = vld [vmem:[#allocation7 + $0x18] sm:$0xff]  ;;  %v384_v8 = vld [vmem:[#allocation7 + $0x10] sm:$0xff] }
  0x16   :  { %v383_v9 = vld [vmem:[#allocation7 + $0x8] sm:$0xff]  ;;  %v382_v10 = vld [vmem:[#allocation7] sm:$0xff]  ;;  %v397_v11 = vld [vmem:[#allocation8 + $0x38] sm:$0xff] }
  0x17   :  { %316 = vmatmul.msk.bf16.vlgmr.msra.gmra.mxu0 %vm103_vm0, %v90_v3  ;;  %279 = vmatpush.bf16.msra.mxu2 %v397_v11  ;;  %v396_v12 = vld [vmem:[#allocation8 + $0x30] sm:$0xff]  ;;  %v395_v13 = vld [vmem:[#allocation8 + $0x28] sm:$0xff]  ;;  %v394_v14 = vld [vmem:[#allocation8 + $0x20] sm:$0xff] }
  0x18   :  { %v405_v15 = vld [vmem:[%s613_s2] ss:$0 sm:$0xff]  ;;  %v393_v24 = vld [vmem:[#allocation8 + $0x18] sm:$0xff]  ;;  %v391_v26 = vld [vmem:[#allocation8 + $0x8] sm:$0xff] }
  0x19   :  { %194 = vmatpush.bf16.msra.mxu1 %v388_v4  ;;  %v392_v25 = vld [vmem:[#allocation8 + $0x10] sm:$0xff]  ;;  %v390_v27 = vld [vmem:[#allocation8] sm:$0xff] }
  0x1a   :  { %v406_v28 = vld [vmem:[%s615_s4] ss:$0 sm:$0xff]  ;;  %s300_s4 = sshll.u32 %s618_s7, 4  ;;  %s301_s4 = int_to_ptr.hbm [resolvable:$true] %s300_s4 }
  0x1b   :  { %280 = vmatpush.bf16.msra.mxu2 %v396_v12  ;;  %v407_v37 = vld [vmem:[%s617_s6] ss:$0 sm:$0xff] }
  0x1d   :  { %195 = vmatpush.bf16.msra.mxu1 %v387_v5 }
  0x1f   :  { %281 = vmatpush.bf16.msra.mxu2 %v395_v13 }
  0x21   :  { %196 = vmatpush.bf16.msra.mxu1 %v386_v6 }
  0x23   :  { %282 = vmatpush.bf16.msra.mxu2 %v394_v14 }
  0x25   :  { %197 = vmatpush.bf16.msra.mxu1 %v385_v7 }
  0x27   :  { %283 = vmatpush.bf16.msra.mxu2 %v393_v24 }
  0x29   :  { %198 = vmatpush.bf16.msra.mxu1 %v384_v8 }
  0x2b   :  { %284 = vmatpush.bf16.msra.mxu2 %v392_v25 }
  0x2d   :  { %199 = vmatpush.bf16.msra.mxu1 %v383_v9 }
  0x2f   :  { %285 = vmatpush.bf16.msra.mxu2 %v391_v26 }
  0x31   :  { %200 = vmatpush.bf16.msra.mxu1 %v382_v10 }
  0x33   :  { %286 = vmatpush.bf16.msra.mxu2 %v390_v27 }
  0x94   :  { %v116_v16 = vpop.f32.mrf.mxu0 }
  0x95   :  { %v117_v17 = vadd.f32 %v405_v15, %v116_v16 }
  0x97   :  { %v120_v18 = vmul.f32 0.5, %v117_v17 }
  0x99   :  { %408 = vtanh.f32 %v120_v18 }
  0x9c   :  { %v118_v19 = vpop.f32.mrf.mxu0 }
  0x9f   :  { %v409_v20 = vpop.eup %408 }
  0xa0   :  { %v122_v21 = vadd.f32 1.0, %v409_v20 }
  0xa2   :  { %v123_v22 = vmul.f32 0.5, %v122_v21 }
  0xa4   :  { %v124_v23 = vpack.c.bf16 %v123_v22, %v123_v22 }
  0xa6   :  { %201 = vmatmul.bf16.vlgmr.msra.gmra.mxu1 %v124_v23 }
 0x123   :  { %v202_v29 = vpop.f32.mrf.mxu1 }
 0x124   :  { %v203_v30 = vadd.f32 %v406_v28, %v202_v29 }
 0x126   :  { %v206_v31 = vmul.f32 0.5, %v203_v30 }
 0x128   :  { %410 = vtanh.f32 %v206_v31 }
 0x12b   :  { %v204_v32 = vpop.f32.mrf.mxu1 }
 0x12e   :  { %v411_v33 = vpop.eup %410 }
 0x12f   :  { %v208_v34 = vadd.f32 1.0, %v411_v33 }
 0x131   :  { %v209_v35 = vmul.f32 0.5, %v208_v34 }
 0x133   :  { %v210_v36 = vpack.c.bf16 %v209_v35, %v209_v35 }
 0x135   :  { %287 = vmatmul.bf16.vlgmr.msra.gmra.mxu2 %v210_v36 }
 0x1b8   :  { %v288_v38 = vpop.f32.mrf.mxu2 }
 0x1b9   :  { %v289_v39 = vadd.f32 %v407_v37, %v288_v38 }
 0x1bb   :  { %292 = vst [vmem:[#allocation10] sm:$0xff] %v289_v39 }
 0x1bc   :  { %303 = dma.vmem_to_hbm [thread:$0]  %s299_s25, 128, %s301_s4, [#allocation4]  }
 0x1c0   :  { %v290_v40 = vpop.f32.mrf.mxu2 }
 0x1c1   :  { %538 = dma.done.wait [#allocation4], 128  }
 0x1c2   :  { %539 = vsyncadd [#allocation4], 4294967168 }
 0x1c3   :  { %308 = vsyncpa [#allocation3], 1 }
 0x1c4   :  { %309 = vsyncpa [#allocation6], 1 }
 0x1c5   :  { %310 = vsyncpa [#allocation9], 1 }
 0x1c6   :  { %311 = vsyncpa [#allocation4], 1 }

</bundles_post_ra>
